<compile_context>
chip_gen: v6e
topology: v6e:2x2x1
jax: 0.10.0
libtpu: 0.0.40
codegen_flags: <defaults>
</compile_context>

<pallas_src>
import jax
import jax.numpy as jnp
from jax.experimental import pallas as pl
from jax.experimental.pallas import tpu as pltpu

LEAKY_SLOPE = 0.01   # nn.LeakyReLU() default negative_slope


def customnet_kernel(x_ref, params_ref, b2_ref, o_ref):
    # Single packed parameter slab: row 0 = i2h, row 1 = bias1, row 2 = h2o (as a row).
    p = params_ref[...]                      # (3, 10) — one vreg-resident load
    w1 = p[0:1, :]                           # (1, 10)
    b1 = p[1:2, :]                           # (1, 10)
    w2 = p[2:3, :]                           # (1, 10)

    # Hidden layer as a VPU outer product: (N,1) * (1,10) -> (N,10).  No MXU push/drain.
    h = x_ref[...] * w1 + b1
    h = jnp.maximum(h, LEAKY_SLOPE * h)      # LeakyReLU: max(h, 0.01*h), slope in (0,1)

    # Output layer as multiply + 10-lane reduce (XLU): (N,10) -> (N,1).  No MXU.
    y = jnp.sum(h * w2, axis=-1, keepdims=True)
    y = y + b2_ref[0]                        # scalar bias2 read from SMEM

    o_ref[...] = y.astype(o_ref.dtype)       # direct (N,1) store; last dim == full extent


def customnet_forward(x, i2h, bias1, h2o, bias2):
    n = x.shape[0]

    # Pack the three tiny parameter arrays into one VMEM input (one DMA instead of three).
    # In a real training setup this concat would live at parameter-setup time, not per call.
    params = jnp.concatenate([i2h, bias1, h2o.reshape(1, 10)], axis=0)  # (3, 10) f32
    b2_scalar = bias2.reshape(1)                                        # (1,) -> SMEM

    # Shapes are tiny: every VMEM array is a single full-extent block (no tiling).
    full_vmem = lambda a: pl.BlockSpec(a.shape, lambda: (0,) * a.ndim)

    flops = 5 * n * 10  # mul + bias + leaky + mul + reduce, all elementwise-scale
    bytes_accessed = 4 * (x.size + params.size + b2_scalar.size + n * 1)

    out = pl.pallas_call(
        customnet_kernel,
        out_shape=jax.ShapeDtypeStruct((n, 1), jnp.float32),
        grid=(),
        in_specs=[
            full_vmem(x),
            full_vmem(params),
            pl.BlockSpec(memory_space=pltpu.MemorySpace.SMEM),  # bias2 scalar, no VMEM DMA
        ],
        out_specs=pl.BlockSpec((n, 1), lambda: (0, 0)),
        cost_estimate=pl.CostEstimate(flops=flops, transcendentals=0,
                                      bytes_accessed=bytes_accessed),
    )(x, params, b2_scalar)

    return out


def reference_forward(x, i2h, bias1, h2o, bias2):
    h = x @ i2h + bias1
    h = jnp.where(h >= 0, h, LEAKY_SLOPE * h)
    return h @ h2o + bias2


if __name__ == "__main__":
    key = jax.random.PRNGKey(0)
    kx, k1, k2, k3, k4 = jax.random.split(key, 5)

    # Deterministic parameter init matching the module's shapes (torch.randn equivalents).
    i2h = jax.random.normal(k1, (1, 10), dtype=jnp.float32)
    h2o = jax.random.normal(k2, (10, 1), dtype=jnp.float32)
    bias1 = jax.random.normal(k3, (1, 10), dtype=jnp.float32)
    bias2 = jax.random.normal(k4, (1, 1), dtype=jnp.float32)

    # Input: x.mm(self.i2h) implies x has shape [N, 1]. Use batch N=8.
    x = jax.random.normal(kx, (8, 1), dtype=jnp.float32)

    out = customnet_forward(x, i2h, bias1, h2o, bias2)
    out = jax.block_until_ready(out)

    ref = reference_forward(x, i2h, bias1, h2o, bias2)
    assert out.shape == (8, 1)
    assert jnp.allclose(out, ref, atol=1e-5, rtol=1e-5), "mismatch vs reference"

    print("KERNEL_OK")
</pallas_src>

<mosaic_0001>
module attributes {stable_mosaic.version = 11 : i64} {
  func.func @customnet_kernel(%arg0: memref<8x1xf32, #tpu.memory_space<vmem>>, %arg1: memref<3x10xf32, #tpu.memory_space<vmem>>, %arg2: memref<1xf32, #tpu.memory_space<smem>>, %arg3: memref<8x1xf32, #tpu.memory_space<vmem>>) attributes {dimension_semantics = [], scalar_prefetch = 0 : i64, scratch_operands = 0 : i64, tpu.core_type = #tpu.core_type<tc>} {
    %c0 = arith.constant 0 : index
    %c0_0 = arith.constant 0 : index
    %0 = vector.load %arg1[%c0, %c0_0] : memref<3x10xf32, #tpu.memory_space<vmem>>, vector<3x10xf32>
    %1 = vector.extract_strided_slice %0 {offsets = [0, 0], sizes = [1, 10], strides = [1, 1]} : vector<3x10xf32> to vector<1x10xf32>
    %2 = vector.extract_strided_slice %0 {offsets = [1, 0], sizes = [1, 10], strides = [1, 1]} : vector<3x10xf32> to vector<1x10xf32>
    %3 = vector.extract_strided_slice %0 {offsets = [2, 0], sizes = [1, 10], strides = [1, 1]} : vector<3x10xf32> to vector<1x10xf32>
    %c0_1 = arith.constant 0 : index
    %c0_2 = arith.constant 0 : index
    %4 = vector.load %arg0[%c0_1, %c0_2] : memref<8x1xf32, #tpu.memory_space<vmem>>, vector<8x1xf32>
    %5 = vector.broadcast %4 : vector<8x1xf32> to vector<8x10xf32>
    %6 = vector.broadcast %1 : vector<1x10xf32> to vector<8x10xf32>
    %7 = arith.mulf %5, %6 : vector<8x10xf32>
    %8 = vector.broadcast %2 : vector<1x10xf32> to vector<8x10xf32>
    %9 = arith.addf %7, %8 : vector<8x10xf32>
    %cst = arith.constant 0.00999999977 : f32
    %10 = vector.broadcast %cst : f32 to vector<8x10xf32>
    %11 = arith.mulf %10, %9 : vector<8x10xf32>
    %12 = arith.maximumf %9, %11 : vector<8x10xf32>
    %13 = vector.broadcast %3 : vector<1x10xf32> to vector<8x10xf32>
    %14 = arith.mulf %12, %13 : vector<8x10xf32>
    %cst_3 = arith.constant dense<0.000000e+00> : vector<8xf32>
    %15 = vector.multi_reduction <add>, %14, %cst_3 [1] : vector<8x10xf32> to vector<8xf32>
    %16 = vector.shape_cast %15 : vector<8xf32> to vector<8x1xf32>
    %c0_4 = arith.constant 0 : index
    %17 = memref.load %arg2[%c0_4] : memref<1xf32, #tpu.memory_space<smem>>
    %18 = vector.broadcast %17 : f32 to vector<8x1xf32>
    %19 = arith.addf %16, %18 : vector<8x1xf32>
    %c0_5 = arith.constant 0 : index
    %c0_6 = arith.constant 0 : index
    %20 = vector.load %arg3[%c0_5, %c0_6] : memref<8x1xf32, #tpu.memory_space<vmem>>, vector<8x1xf32>
    tpu.vector_store %arg3[%c0_5, %c0_6], %19 {strides = array<i32>} : memref<8x1xf32, #tpu.memory_space<vmem>>, vector<8x1xf32>,
    return
  }
}

</mosaic_0001>

<bundles_post_ra>
// kernel: tpu_custom_call.1
= control target key start
LH: loop header
LB: loop body
LE: loop exit
PB: predicated region body
PF: predicated region fallthrough
CT: control target
= control target key end

     0   :  { %v54_v0 = vmov 0   ;;  %v22_v2 = vlaneseq  ;;  %vm39_vm0 = vcmask 80896   ;;  %vm46_vm1 = vcmask 7168   ;;  %s87_s0 = inlined_call_operand.vmem [shape: f32[8,1], index: 0, kind: input, shape index: {}]   ;;  %s88_s1 = inlined_call_operand.vmem [shape: f32[3,10], index: 1, kind: input, shape index: {}]   ;;  %s89_s2 = inlined_call_operand.<no memory space> [shape: f32[1], index: 2, kind: input, shape index: {}]   ;;  %s90_s3 = inlined_call_operand.vmem [shape: f32[8,1], index: 3, kind: output, shape index: {}]  }
   0x1   :  { %53 = vset.pattern.permute.xlu0 %v54_v0  ;;  %v16_v1 = vld [vmem:[%s87_s0] sm:$0xff]  ;;  %v44_v18 = vstv %s89_s2 }
   0x2   :  { %19 = vperm.xlu0 %53, %v16_v1   ;;  %v23_v3 = vshrl.u32 %v22_v2, 7  ;;  %v15_v5 = vld [vmem:[%s88_s1] sm:$0x7] }
   0x4   :  { %v24_v4 = vsub.s32 0, %v23_v3  ;;  %v29_v6 = vsub.s32 1, %v23_v3  ;;  %v36_v11 = vsub.s32 2, %v23_v3 }
   0x6   :  { %v25_v7 = vrot.slane %v15_v5, %v24_v4  ;;  %v30_v8 = vrot.slane %v15_v5, %v29_v6  ;;  %v37_v14 = vrot.slane %v15_v5, %v36_v11 }
  0x7d   :  { %v20_v9 = vpop.permute.xlu0 %19 }
  0x7e   :  { %v26_v10 = vmul.f32 %v25_v7, %v20_v9 }
  0x80   :  { %v31_v12 = vadd.f32 %v30_v8, %v26_v10 }
  0x82   :  { %v32_v13 = vmul.f32 0.01, %v31_v12 }
  0x84   :  { %v33_v15 = vmax.f32 %v31_v12, %v32_v13 }
  0x86   :  { %v38_v16 = vmul.f32 %v37_v14, %v33_v15 }
  0x88   :  { %v40_v17 = vsel %vm39_vm0, %v38_v16, 0.0 }
  0x89   :  { %41 = vadd.xlane.f32.xlu0 %v40_v17 }
 0x112   :  { %v42_v19 = vpop.xlane.xlu0 %41 }
 0x113   :  { %v45_v20 = vadd.f32 %v44_v18, %v42_v19 }
 0x115   :  { %47 = vst.msk [vmem:[%s90_s3] sm:$0xff] %vm46_vm1, %v45_v20 }

</bundles_post_ra>
